<compile_context>
chip_gen: v5e
topology: v5e:2x2
jax: 0.10.0
libtpu: 0.0.40
codegen_flags: <defaults>
</compile_context>

<pallas_src>
import jax
import jax.numpy as jnp
from jax.experimental import pallas as pl
from jax.experimental.pallas import tpu as pltpu


def attentive_pool_kernel(x_ref, w_ref, b_ref, o_ref):
    # x_ref: (TB, T, D) VMEM block of batch rows
    # w_ref: (1, D)     VMEM (Linear weight, out_features=1)
    # b_ref: (1, 1)     SMEM (Linear bias scalar)
    # o_ref: (TB, D)    VMEM output block
    x = x_ref[...].astype(jnp.float32)            # (TB, T, D)
    w = w_ref[...].reshape(1, 1, -1)              # (1, 1, D)
    b = b_ref[0, 0]                               # scalar

    # scores (TB, T): VPU multiply + lane reduction over D (keep off the MXU).
    scores = jnp.sum(x * w, axis=-1) + b          # (TB, T), T on lanes

    # Numerically stable softmax over the sequence axis, lane-dense layout.
    m = jnp.max(scores, axis=-1, keepdims=True)   # (TB, 1)
    e = jnp.exp(scores - m)                       # (TB, T)
    l = jnp.sum(e, axis=-1, keepdims=True)        # (TB, 1)
    inv_l = pl.reciprocal(l, approx=True)         # EUP slot
    inv_l = inv_l * (2.0 - l * inv_l)             # one Newton step -> full f32 accuracy
    att = e * inv_l                               # (TB, T)

    # Weighted sum over T (sublane reduce) -> (TB, D).
    o_ref[...] = jnp.sum(x * att[:, :, None], axis=1).astype(o_ref.dtype)


def _round_up(a, m):
    return (a + m - 1) // m * m


def attentive_pooling(x, w, b, *, block_b=None,
                      vmem_tile_budget_bytes=16 * 1024 * 1024):
    """x: (B, T, D) f32; w: (1, D) f32; b: (1, 1) f32 -> (B, D) f32."""
    B, T, D = x.shape

    # Pick the batch block from a VMEM budget: double-buffered input tile + output tile.
    if block_b is None:
        bytes_per_row = (2 * T * D + D) * x.dtype.itemsize
        block_b = max(8, min(512, (vmem_tile_budget_bytes // bytes_per_row) // 8 * 8))
    block_b = min(block_b, _round_up(B, 8))       # don't over-pad tiny batches
    block_b = max(8, _round_up(block_b, 8))       # sublane-aligned output stores

    B_pad = _round_up(B, block_b)
    if B_pad != B:
        # Zero padding is safe: padded rows get a uniform softmax over zeros -> output 0.
        x = jnp.pad(x, ((0, B_pad - B), (0, 0), (0, 0)))

    out = pl.pallas_call(
        attentive_pool_kernel,
        out_shape=jax.ShapeDtypeStruct((B_pad, D), x.dtype),
        grid=(B_pad // block_b,),
        in_specs=[
            pl.BlockSpec((block_b, T, D), lambda i: (i, 0, 0)),
            pl.BlockSpec((1, D), lambda i: (0, 0)),
            pl.BlockSpec(memory_space=pltpu.MemorySpace.SMEM),
        ],
        out_specs=pl.BlockSpec((block_b, D), lambda i: (i, 0)),
        compiler_params=pltpu.CompilerParams(
            dimension_semantics=("parallel",),
            vmem_limit_bytes=32 * 1024 * 1024,
        ),
    )(x, w, b)
    return out[:B]


def attentive_pooling_ref(x, w, b):
    scores = jnp.einsum("btd,d->bt", x, w[0]) + b[0, 0]          # (B, T)
    att = jax.nn.softmax(scores, axis=-1)[..., None]             # (B, T, 1)
    return jnp.sum(x * att, axis=1)                              # (B, D)


if __name__ == "__main__":
    B, T, D = 2, 8, 32  # batch, seq, hidden (input_dim)
    key = jax.random.PRNGKey(0)
    kx, kw, kb = jax.random.split(key, 3)

    x = jax.random.normal(kx, (B, T, D), dtype=jnp.float32)
    # nn.Linear(input_dim, 1): weight (1, D), bias (1,) -- deterministic synthetic init
    w = jax.random.normal(kw, (1, D), dtype=jnp.float32) * 0.1
    b = jax.random.normal(kb, (1, 1), dtype=jnp.float32) * 0.1

    out = attentive_pooling(x, w, b)
    out = jax.block_until_ready(out)

    ref = attentive_pooling_ref(x, w, b)
    assert out.shape == (B, D)
    assert jnp.allclose(out, ref, atol=1e-5, rtol=1e-5), "mismatch vs reference"

    print("KERNEL_OK")
</pallas_src>

<mosaic_0001>
module attributes {stable_mosaic.version = 11 : i64} {
  func.func @attentive_pool_kernel(%arg0: i32, %arg1: memref<8x8x32xf32, #tpu.memory_space<vmem>>, %arg2: memref<1x32xf32, #tpu.memory_space<vmem>>, %arg3: memref<1x1xf32, #tpu.memory_space<smem>>, %arg4: memref<8x32xf32, #tpu.memory_space<vmem>>) attributes {dimension_semantics = [#tpu.dimension_semantics<parallel>], iteration_bounds = array<i64: 1>, scalar_prefetch = 0 : i64, scratch_operands = 0 : i64, tpu.core_type = #tpu.core_type<tc>, window_params = [{transform_indices = @transform_0, window_bounds = array<i64: 8, 8, 32>}, {pipeline_mode = #tpu.pipeline_mode<synchronous>, transform_indices = @transform_1, window_bounds = array<i64: 1, 32>}, {transform_indices = @transform_2, window_bounds = array<i64: 1, 1>}, {transform_indices = @transform_3, window_bounds = array<i64: 8, 32>}]} {
    %c0 = arith.constant 0 : index
    %c0_0 = arith.constant 0 : index
    %c0_1 = arith.constant 0 : index
    %0 = vector.load %arg1[%c0, %c0_0, %c0_1] : memref<8x8x32xf32, #tpu.memory_space<vmem>>, vector<8x8x32xf32>
    %c0_2 = arith.constant 0 : index
    %c0_3 = arith.constant 0 : index
    %1 = vector.load %arg2[%c0_2, %c0_3] : memref<1x32xf32, #tpu.memory_space<vmem>>, vector<1x32xf32>
    %2 = vector.shape_cast %1 : vector<1x32xf32> to vector<1x1x32xf32>
    %c0_4 = arith.constant 0 : index
    %c0_5 = arith.constant 0 : index
    %3 = memref.load %arg3[%c0_4, %c0_5] : memref<1x1xf32, #tpu.memory_space<smem>>
    %4 = vector.broadcast %2 : vector<1x1x32xf32> to vector<8x8x32xf32>
    %5 = arith.mulf %0, %4 : vector<8x8x32xf32>
    %cst = arith.constant dense<0.000000e+00> : vector<8x8xf32>
    %6 = vector.multi_reduction <add>, %5, %cst [2] : vector<8x8x32xf32> to vector<8x8xf32>
    %7 = vector.broadcast %3 : f32 to vector<8x8xf32>
    %8 = arith.addf %6, %7 : vector<8x8xf32>
    %cst_6 = arith.constant dense<0xFF800000> : vector<8xf32>
    %9 = vector.multi_reduction <maximumf>, %8, %cst_6 [1] : vector<8x8xf32> to vector<8xf32>
    %10 = vector.shape_cast %9 : vector<8xf32> to vector<8x1xf32>
    %11 = vector.broadcast %10 : vector<8x1xf32> to vector<8x8xf32>
    %12 = arith.subf %8, %11 : vector<8x8xf32>
    %13 = math.exp %12 : vector<8x8xf32>
    %cst_7 = arith.constant dense<0.000000e+00> : vector<8xf32>
    %14 = vector.multi_reduction <add>, %13, %cst_7 [1] : vector<8x8xf32> to vector<8xf32>
    %15 = vector.shape_cast %14 : vector<8xf32> to vector<8x1xf32>
    %16 = tpu.reciprocal %15 {approx = true} : vector<8x1xf32> -> vector<8x1xf32>
    %17 = arith.mulf %15, %16 : vector<8x1xf32>
    %cst_8 = arith.constant 2.000000e+00 : f32
    %18 = vector.broadcast %cst_8 : f32 to vector<8x1xf32>
    %19 = arith.subf %18, %17 : vector<8x1xf32>
    %20 = arith.mulf %16, %19 : vector<8x1xf32>
    %21 = vector.broadcast %20 : vector<8x1xf32> to vector<8x8xf32>
    %22 = arith.mulf %13, %21 : vector<8x8xf32>
    %23 = vector.shape_cast %22 : vector<8x8xf32> to vector<8x8x1xf32>
    %24 = vector.broadcast %23 : vector<8x8x1xf32> to vector<8x8x32xf32>
    %25 = arith.mulf %0, %24 : vector<8x8x32xf32>
    %cst_9 = arith.constant dense<0.000000e+00> : vector<8x32xf32>
    %26 = vector.multi_reduction <add>, %25, %cst_9 [1] : vector<8x8x32xf32> to vector<8x32xf32>
    %c0_10 = arith.constant 0 : index
    %c0_11 = arith.constant 0 : index
    %27 = vector.load %arg4[%c0_10, %c0_11] : memref<8x32xf32, #tpu.memory_space<vmem>>, vector<8x32xf32>
    tpu.vector_store %arg4[%c0_10, %c0_11], %26 {strides = array<i32>} : memref<8x32xf32, #tpu.memory_space<vmem>>, vector<8x32xf32>,
    return
  }
  func.func @transform_0(%arg0: i32) -> (i32, i32, i32) {
    %c0_i32 = arith.constant 0 : i32
    %c0_i32_0 = arith.constant 0 : i32
    %c0_i32_1 = arith.constant 0 : i32
    return %arg0, %c0_i32, %c0_i32_0 : i32, i32, i32
  }
  func.func @transform_1(%arg0: i32) -> (i32, i32) {
    %c0_i32 = arith.constant 0 : i32
    %c0_i32_0 = arith.constant 0 : i32
    %c0_i32_1 = arith.constant 0 : i32
    return %c0_i32, %c0_i32_0 : i32, i32
  }
  func.func @transform_2(%arg0: i32) -> (i32, i32) {
    %c0_i32 = arith.constant 0 : i32
    %c0_i32_0 = arith.constant 0 : i32
    %c0_i32_1 = arith.constant 0 : i32
    return %c0_i32, %c0_i32_0 : i32, i32
  }
  func.func @transform_3(%arg0: i32) -> (i32, i32) {
    %c0_i32 = arith.constant 0 : i32
    %c0_i32_0 = arith.constant 0 : i32
    return %arg0, %c0_i32 : i32, i32
  }
}

</mosaic_0001>

<bundles_post_ra>
// kernel: tpu_custom_call.1
= control target key start
LH: loop header
LB: loop body
LE: loop exit
PB: predicated region body
PF: predicated region fallthrough
CT: control target
= control target key end

     0   :  { %9 = vsyncpa [#allocation4], 0  ;;  %s593_s0 = inlined_call_operand.hbm [shape: f32[8,8,32], index: 0, kind: input, shape index: {}]   ;;  %s594_s1 = inlined_call_operand.vmem [shape: f32[1,32], index: 1, kind: input, shape index: {}]   ;;  %s595_s2 = inlined_call_operand.<no memory space> [shape: f32[1,1], index: 2, kind: input, shape index: {}]   ;;  %s596_s3 = inlined_call_operand.hbm [shape: f32[8,32], index: 3, kind: output, shape index: {}]  }
   0x1   :  { %10 = vsyncpa [#allocation5], 0  ;;  %s15_s14 = sshll.u32 %s593_s0, 4  ;;  %s462_s15 = smov [#allocation3]   ;;  %s16_s14 = int_to_ptr.hbm [resolvable:$true] %s15_s14 }
   0x2   :  { %s17_s16 = sshll.u32 %s462_s15, 4  ;;  %s463_s17 = smov 128   ;;  %s18_s16 = int_to_ptr.vmem [resolvable:$true] %s17_s16 }
   0x3   :  { %s464_s18 = smov 8  }
   0x4   :  { %23 = dma.hbm_to_vmem [thread:$0]  %s16_s14, 1024, %s18_s16, [#allocation4], %s463_s17, %s463_s17, %s464_s18  }
   0x5   :  { %458 = dma.done.wait [#allocation4], 1024  }
   0x6   :  { %459 = vsyncadd [#allocation4], 4294966272  ;;  %v490_v0 = vld [vmem:[#allocation3] sm:$0xff]  ;;  %vm53_vm0 = vcmask 261120   ;;  %v495_v2 = vld [vmem:[#allocation3 + $0x10] sm:$0xff]  ;;  %v95_v28 = vlaneseq  ;;  %v78_v29 = vstv %s595_s2  ;;  %vm105_vm1 = vcmask 1041409  }
   0x7   :  { %v391_v1 = vld [vmem:[%s594_s1] ss:$0 sm:$0xff]  ;;  %v502_v7 = vld [vmem:[#allocation3 + $0x8] sm:$0xff]  ;;  %v504_v8 = vld [vmem:[#allocation3 + $0x18] sm:$0xff]  ;;  %vm107_vm2 = vcmask 1042434   ;;  %vm109_vm3 = vcmask 1043459  }
   0x8   :  { %v497_v3 = vld [vmem:[#allocation3 + $0x20] sm:$0xff]  ;;  %v45_v4 = vmul.f32 %v391_v1, %v490_v0  ;;  %v47_v5 = vmul.f32 %v391_v1, %v495_v2  ;;  %v509_v12 = vld [vmem:[#allocation3 + $0x28] sm:$0xff]  ;;  %v46_v13 = vmul.f32 %v391_v1, %v502_v7  ;;  %v48_v14 = vmul.f32 %v391_v1, %v504_v8  ;;  %v517_v19 = vld [vmem:[#allocation3 + $0x30] sm:$0xff]  ;;  %s466_s2 = smov [#allocation6]   ;;  %s373_s24 = sshll.u32 %s596_s3, 4  ;;  %s374_s24 = int_to_ptr.hbm [resolvable:$true] %s373_s24 }
   0x9   :  { %v49_v6 = vmul.f32 %v391_v1, %v497_v3  ;;  %v50_v15 = vmul.f32 %v391_v1, %v509_v12  ;;  %v519_v20 = vld [vmem:[#allocation3 + $0x38] sm:$0xff]  ;;  %v51_v21 = vmul.f32 %v391_v1, %v517_v19  ;;  %v528_v30 = vand.u32 127, %v95_v28  ;;  %s371_s21 = sshll.u32 %s466_s2, 4  ;;  %s372_s21 = int_to_ptr.vmem [resolvable:$true] %s371_s21 }
   0xa   :  { %v54_v9 = vsel %vm53_vm0, %v45_v4, 0.0  ;;  %v60_v10 = vsel %vm53_vm0, %v47_v5, 0.0  ;;  %v57_v16 = vsel %vm53_vm0, %v46_v13, 0.0  ;;  %v63_v17 = vsel %vm53_vm0, %v48_v14, 0.0 }
   0xb   :  { %v66_v11 = vsel %vm53_vm0, %v49_v6, 0.0  ;;  %55 = vadd.xlane.f32.xlu0 %v54_v9  ;;  %61 = vadd.xlane.f32.xlu1 %v60_v10  ;;  %v69_v18 = vsel %vm53_vm0, %v50_v15, 0.0  ;;  %v52_v22 = vmul.f32 %v391_v1, %v519_v20  ;;  %v72_v23 = vsel %vm53_vm0, %v51_v21, 0.0 }
   0xc   :  { %67 = vadd.xlane.f32.xlu2 %v66_v11  ;;  %vm111_vm4 = vcmask 1044484   ;;  %vm113_vm5 = vcmask 1045509   ;;  %vm115_vm6 = vcmask 1046534   ;;  %vm117_vm7 = vcmask 1047559  }
   0xd   :  { %v75_v24 = vsel %vm53_vm0, %v52_v22, 0.0  ;;  %vm120_vm8 = vcmask 64512   ;;  %v465_v60 = vmov 0  }
   0xe   :  { %390 = vset.pattern.permute.xlu2 %v465_v60  ;;  %389 = vset.pattern.permute.xlu1 %v465_v60 }
   0xf   :  { %388 = vset.pattern.permute.xlu0 %v465_v60 }
  0x13   :  { %58 = vadd.xlane.f32.xlu0 %v57_v16  ;;  %64 = vadd.xlane.f32.xlu1 %v63_v17 }
  0x14   :  { %70 = vadd.xlane.f32.xlu2 %v69_v18 }
  0x1b   :  { %73 = vadd.xlane.f32.xlu0 %v72_v23  ;;  %76 = vadd.xlane.f32.xlu1 %v75_v24 }
  0x7e   :  { %v56_v25 = vpop.xlane.xlu0 %55  ;;  %v62_v26 = vpop.xlane.xlu1 %61 }
  0x7f   :  { %v68_v27 = vpop.xlane.xlu2 %67  ;;  %v79_v31 = vadd.f32 %v78_v29, %v56_v25  ;;  %v81_v32 = vadd.f32 %v78_v29, %v62_v26 }
  0x80   :  { %v83_v39 = vadd.f32 %v78_v29, %v68_v27 }
  0x81   :  { %v97_v38 = vperm.slane %v79_v31, %v528_v30  ;;  %v99_v42 = vperm.slane %v81_v32, %v528_v30 }
  0x82   :  { %v101_v46 = vperm.slane %v83_v39, %v528_v30 }
  0x86   :  { %v59_v33 = vpop.xlane.xlu0 %58  ;;  %v65_v34 = vpop.xlane.xlu1 %64 }
  0x87   :  { %v80_v35 = vadd.f32 %v78_v29, %v59_v33  ;;  %v82_v36 = vadd.f32 %v78_v29, %v65_v34  ;;  %v71_v37 = vpop.xlane.xlu2 %70 }
  0x88   :  { %v84_v43 = vadd.f32 %v78_v29, %v71_v37 }
  0x89   :  { %v98_v40 = vperm.slane %v80_v35, %v528_v30  ;;  %v100_v41 = vperm.slane %v82_v36, %v528_v30 }
  0x8a   :  { %v102_v48 = vperm.slane %v84_v43, %v528_v30 }
  0x8b   :  { %v106_v44 = vsel %vm105_vm1, %v98_v40, %v97_v38 }
  0x8c   :  { %v108_v45 = vsel %vm107_vm2, %v99_v42, %v106_v44 }
  0x8d   :  { %v110_v47 = vsel %vm109_vm3, %v100_v41, %v108_v45 }
  0x8e   :  { %v74_v49 = vpop.xlane.xlu0 %73  ;;  %v77_v50 = vpop.xlane.xlu1 %76  ;;  %v112_v53 = vsel %vm111_vm4, %v101_v46, %v110_v47 }
  0x8f   :  { %v85_v51 = vadd.f32 %v78_v29, %v74_v49  ;;  %v86_v52 = vadd.f32 %v78_v29, %v77_v50  ;;  %v114_v56 = vsel %vm113_vm5, %v102_v48, %v112_v53 }
  0x91   :  { %v103_v54 = vperm.slane %v85_v51, %v528_v30  ;;  %v104_v55 = vperm.slane %v86_v52, %v528_v30 }
  0x93   :  { %v116_v57 = vsel %vm115_vm6, %v103_v54, %v114_v56 }
  0x94   :  { %v118_v58 = vsel %vm117_vm7, %v104_v55, %v116_v57 }
  0x95   :  { %v121_v59 = vsel %vm120_vm8, %v118_v58, -inf }
  0x96   :  { %122 = vmax.xlane.f32.xlu2 %v121_v59 }
 0x109   :  { %v123_v61 = vpop.xlane.xlu2 %122 }
 0x10a   :  { %v127_v62 = vperm.slane %v123_v61, 2  ;;  %v126_v63 = vperm.slane %v123_v61, 1  ;;  %v125_v1 = vperm.slane %v123_v61, 0  ;;  %v128_v9 = vperm.slane %v123_v61, 3 }
 0x10b   :  { %v129_v10 = vperm.slane %v123_v61, 4  ;;  %v132_v11 = vperm.slane %v123_v61, 7  ;;  %v130_v22 = vperm.slane %v123_v61, 5  ;;  %v131_v24 = vperm.slane %v123_v61, 6 }
 0x10c   :  { %v143_v4 = vsub.f32 %v81_v32, %v127_v62  ;;  %v142_v5 = vsub.f32 %v80_v35, %v126_v63  ;;  %v141_v6 = vsub.f32 %v79_v31, %v125_v1  ;;  %v144_v16 = vsub.f32 %v82_v36, %v128_v9 }
 0x10d   :  { %v145_v17 = vsub.f32 %v83_v39, %v129_v10  ;;  %v148_v18 = vsub.f32 %v86_v52, %v132_v11  ;;  %v146_v29 = vsub.f32 %v84_v43, %v130_v22  ;;  %v147_v31 = vsub.f32 %v85_v51, %v131_v24 }
 0x10e   :  { %v153_v13 = vmul.f32 1.442695, %v143_v4  ;;  %v151_v14 = vmul.f32 1.442695, %v142_v5  ;;  %v149_v15 = vmul.f32 1.442695, %v141_v6 }
 0x10f   :  { %v155_v21 = vmul.f32 1.442695, %v144_v16  ;;  %v157_v23 = vmul.f32 1.442695, %v145_v17  ;;  %v163_v26 = vmul.f32 1.442695, %v148_v18 }
 0x110   :  { %392 = vpow2.f32 %v153_v13  ;;  %v159_v32 = vmul.f32 1.442695, %v146_v29  ;;  %v161_v33 = vmul.f32 1.442695, %v147_v31 }
 0x111   :  { %394 = vpow2.f32 %v151_v14 }
 0x112   :  { %396 = vpow2.f32 %v149_v15 }
 0x113   :  { %398 = vpow2.f32 %v155_v21 }
 0x114   :  { %400 = vpow2.f32 %v157_v23 }
 0x115   :  { %402 = vpow2.f32 %v163_v26 }
 0x116   :  { %v546_v25 = vpop.eup %392  ;;  %404 = vpow2.f32 %v159_v32 }
 0x117   :  { %v395_v27 = vpop.eup %394  ;;  %180 = vperm.xlu2 %390, %v546_v25   ;;  %406 = vpow2.f32 %v161_v33 }
 0x118   :  { %v397_v28 = vpop.eup %396  ;;  %177 = vperm.xlu1 %389, %v395_v27  }
 0x119   :  { %174 = vperm.xlu0 %388, %v397_v28   ;;  %v399_v34 = vpop.eup %398 }
 0x11a   :  { %v401_v35 = vpop.eup %400 }
 0x11b   :  { %v403_v36 = vpop.eup %402 }
 0x11c   :  { %v405_v37 = vpop.eup %404 }
 0x11d   :  { %v407_v38 = vpop.eup %406 }
 0x11f   :  { %183 = vperm.xlu2 %390, %v399_v34  }
 0x120   :  { %186 = vperm.xlu1 %389, %v401_v35  }
 0x121   :  { %195 = vperm.xlu0 %388, %v403_v36  }
 0x127   :  { %189 = vperm.xlu2 %390, %v405_v37  }
 0x128   :  { %192 = vperm.xlu1 %389, %v407_v38  }
 0x171   :  { %v181_v39 = vpop.permute.xlu2 %180 }
 0x172   :  { %v199_v47 = vperm.slane %v181_v39, %v528_v30 }
 0x179   :  { %v184_v42 = vpop.permute.xlu2 %183 }
 0x17a   :  { %v200_v50 = vperm.slane %v184_v42, %v528_v30 }
 0x181   :  { %v190_v51 = vpop.permute.xlu2 %189 }
 0x182   :  { %v202_v55 = vperm.slane %v190_v51, %v528_v30 }
 0x18a   :  { %v178_v40 = vpop.permute.xlu1 %177 }
 0x18b   :  { %v175_v41 = vpop.permute.xlu0 %174  ;;  %v198_v43 = vperm.slane %v178_v40, %v528_v30 }
 0x18c   :  { %v197_v44 = vperm.slane %v175_v41, %v528_v30 }
 0x18e   :  { %v205_v45 = vsel %vm105_vm1, %v198_v43, %v197_v44 }
 0x18f   :  { %v206_v48 = vsel %vm107_vm2, %v199_v47, %v205_v45 }
 0x190   :  { %v207_v52 = vsel %vm109_vm3, %v200_v50, %v206_v48 }
 0x192   :  { %v187_v46 = vpop.permute.xlu1 %186 }
 0x193   :  { %v201_v49 = vperm.slane %v187_v46, %v528_v30  ;;  %v196_v54 = vpop.permute.xlu0 %195 }
 0x194   :  { %v204_v58 = vperm.slane %v196_v54, %v528_v30 }
 0x195   :  { %v208_v53 = vsel %vm111_vm4, %v201_v49, %v207_v52 }
 0x196   :  { %v209_v59 = vsel %vm113_vm5, %v202_v55, %v208_v53 }
 0x19a   :  { %v193_v56 = vpop.permute.xlu1 %192 }
 0x19b   :  { %v203_v57 = vperm.slane %v193_v56, %v528_v30 }
 0x19d   :  { %v210_v60 = vsel %vm115_vm6, %v203_v57, %v209_v59 }
 0x19e   :  { %v211_v61 = vsel %vm117_vm7, %v204_v58, %v210_v60 }
 0x19f   :  { %v213_v62 = vsel %vm120_vm8, %v211_v61, 0.0 }
 0x1a0   :  { %214 = vadd.xlane.f32.xlu2 %v213_v62 }
 0x213   :  { %v215_v63 = vpop.xlane.xlu2 %214 }
 0x214   :  { %408 = vrcp.f32 %v215_v63 }
 0x21a   :  { %v409_v1 = vpop.eup %408 }
 0x21b   :  { %v217_v4 = vmul.f32 %v409_v1, %v215_v63 }
 0x21d   :  { %v218_v5 = vsub.f32 2.0, %v217_v4 }
 0x21f   :  { %v219_v6 = vmul.f32 %v409_v1, %v218_v5 }
 0x221   :  { %v222_v9 = vperm.slane %v219_v6, 1  ;;  %v221_v10 = vperm.slane %v219_v6, 0  ;;  %v224_v30 = vperm.slane %v219_v6, 3  ;;  %v223_v14 = vperm.slane %v219_v6, 2 }
 0x222   :  { %v226_v17 = vperm.slane %v219_v6, 5  ;;  %v225_v18 = vperm.slane %v219_v6, 4  ;;  %v228_v23 = vperm.slane %v219_v6, 7  ;;  %v227_v24 = vperm.slane %v219_v6, 6 }
 0x223   :  { %v238_v11 = vmul.f32 %v395_v27, %v222_v9  ;;  %v237_v13 = vmul.f32 %v397_v28, %v221_v10  ;;  %v240_v15 = vmul.f32 %v399_v34, %v224_v30  ;;  %v239_v16 = vmul.f32 %v546_v25, %v223_v14 }
 0x224   :  { %v242_v21 = vmul.f32 %v405_v37, %v226_v17  ;;  %v241_v22 = vmul.f32 %v401_v35, %v225_v18  ;;  %v244_v26 = vmul.f32 %v403_v36, %v228_v23  ;;  %v243_v27 = vmul.f32 %v407_v38, %v227_v24 }
 0x225   :  { %252 = vperm.xlu0 %388, %v238_v11   ;;  %247 = vperm.xlu1 %389, %v237_v13  }
 0x22d   :  { %262 = vperm.xlu0 %388, %v240_v15   ;;  %257 = vperm.xlu1 %389, %v239_v16  }
 0x235   :  { %272 = vperm.xlu0 %388, %v242_v21   ;;  %267 = vperm.xlu1 %389, %v241_v22  }
 0x23d   :  { %282 = vperm.xlu0 %388, %v244_v26   ;;  %277 = vperm.xlu1 %389, %v243_v27  }
 0x297   :  { %v253_v28 = vpop.permute.xlu0 %252  ;;  %v248_v29 = vpop.permute.xlu1 %247 }
 0x298   :  { %v286_v31 = vmul.f32 %v253_v28, %v502_v7  ;;  %v285_v25 = vmul.f32 %v248_v29, %v490_v0 }
 0x29a   :  { %v300_v32 = vsel %vm53_vm0, %v286_v31, 0.0  ;;  %v293_v33 = vsel %vm53_vm0, %v285_v25, 0.0 }
 0x29b   :  { %v301_v34 = vrot.slane %v300_v32, 4  ;;  %v294_v35 = vrot.slane %v293_v33, 4 }
 0x29d   :  { %v302_v38 = vadd.f32 %v301_v34, %v300_v32  ;;  %v295_v41 = vadd.f32 %v294_v35, %v293_v33 }
 0x29f   :  { %v263_v37 = vpop.permute.xlu0 %262  ;;  %v258_v39 = vpop.permute.xlu1 %257  ;;  %v303_v44 = vrot.slane %v302_v38, 2  ;;  %v296_v45 = vrot.slane %v295_v41, 2 }
 0x2a0   :  { %v288_v40 = vmul.f32 %v263_v37, %v504_v8  ;;  %v287_v36 = vmul.f32 %v258_v39, %v495_v2 }
 0x2a1   :  { %v304_v2 = vadd.f32 %v303_v44, %v302_v38  ;;  %v297_v52 = vadd.f32 %v296_v45, %v295_v41 }
 0x2a2   :  { %v314_v42 = vsel %vm53_vm0, %v288_v40, 0.0  ;;  %v307_v7 = vsel %vm53_vm0, %v287_v36, 0.0 }
 0x2a3   :  { %v315_v43 = vrot.slane %v314_v42, 4  ;;  %v308_v0 = vrot.slane %v307_v7, 4  ;;  %v305_v59 = vrot.slane %v304_v2, 1  ;;  %v298_v60 = vrot.slane %v297_v52, 1 }
 0x2a5   :  { %v309_v46 = vadd.f32 %v308_v0, %v307_v7  ;;  %v316_v47 = vadd.f32 %v315_v43, %v314_v42  ;;  %v306_v10 = vadd.f32 %v305_v59, %v304_v2  ;;  %v299_v11 = vadd.f32 %v298_v60, %v297_v52 }
 0x2a7   :  { %v310_v48 = vrot.slane %v309_v46, 2  ;;  %v273_v49 = vpop.permute.xlu0 %272  ;;  %v268_v50 = vpop.permute.xlu1 %267  ;;  %v317_v53 = vrot.slane %v316_v47, 2  ;;  %v357_v26 = vsel %vm105_vm1, %v306_v10, %v299_v11 }
 0x2a8   :  { %v290_v51 = vmul.f32 %v273_v49, %v509_v12  ;;  %v289_v8 = vmul.f32 %v268_v50, %v497_v3 }
 0x2a9   :  { %v311_v56 = vadd.f32 %v310_v48, %v309_v46  ;;  %v318_v63 = vadd.f32 %v317_v53, %v316_v47 }
 0x2aa   :  { %v328_v54 = vsel %vm53_vm0, %v290_v51, 0.0  ;;  %v321_v55 = vsel %vm53_vm0, %v289_v8, 0.0 }
 0x2ab   :  { %v329_v57 = vrot.slane %v328_v54, 4  ;;  %v322_v58 = vrot.slane %v321_v55, 4  ;;  %v312_v1 = vrot.slane %v311_v56, 1  ;;  %v319_v30 = vrot.slane %v318_v63, 1 }
 0x2ad   :  { %v330_v61 = vadd.f32 %v329_v57, %v328_v54  ;;  %v323_v62 = vadd.f32 %v322_v58, %v321_v55  ;;  %v313_v17 = vadd.f32 %v312_v1, %v311_v56 }
 0x2af   :  { %v331_v4 = vrot.slane %v330_v61, 2  ;;  %v324_v12 = vrot.slane %v323_v62, 2  ;;  %v283_v5 = vpop.permute.xlu0 %282  ;;  %v278_v3 = vpop.permute.xlu1 %277 }
 0x2b0   :  { %v292_v6 = vmul.f32 %v283_v5, %v519_v20  ;;  %v291_v9 = vmul.f32 %v278_v3, %v517_v19  ;;  %v320_v20 = vadd.f32 %v319_v30, %v318_v63  ;;  %v358_v19 = vsel %vm107_vm2, %v313_v17, %v357_v26 }
 0x2b1   :  { %v325_v13 = vadd.f32 %v324_v12, %v323_v62  ;;  %v332_v14 = vadd.f32 %v331_v4, %v330_v61 }
 0x2b2   :  { %v342_v15 = vsel %vm53_vm0, %v292_v6, 0.0  ;;  %v335_v16 = vsel %vm53_vm0, %v291_v9, 0.0  ;;  %v359_v34 = vsel %vm109_vm3, %v320_v20, %v358_v19 }
 0x2b3   :  { %v326_v18 = vrot.slane %v325_v13, 1  ;;  %v343_v21 = vrot.slane %v342_v15, 4  ;;  %v336_v22 = vrot.slane %v335_v16, 4  ;;  %v333_v27 = vrot.slane %v332_v14, 1 }
 0x2b5   :  { %v344_v23 = vadd.f32 %v343_v21, %v342_v15  ;;  %v337_v24 = vadd.f32 %v336_v22, %v335_v16  ;;  %v327_v28 = vadd.f32 %v326_v18, %v325_v13  ;;  %v334_v33 = vadd.f32 %v333_v27, %v332_v14 }
 0x2b7   :  { %v345_v29 = vrot.slane %v344_v23, 2  ;;  %v338_v31 = vrot.slane %v337_v24, 2  ;;  %v360_v35 = vsel %vm111_vm4, %v327_v28, %v359_v34 }
 0x2b8   :  { %v361_v38 = vsel %vm113_vm5, %v334_v33, %v360_v35 }
 0x2b9   :  { %v346_v25 = vadd.f32 %v345_v29, %v344_v23  ;;  %v339_v32 = vadd.f32 %v338_v31, %v337_v24 }
 0x2bb   :  { %v347_v37 = vrot.slane %v346_v25, 1  ;;  %v340_v39 = vrot.slane %v339_v32, 1 }
 0x2bd   :  { %v348_v40 = vadd.f32 %v347_v37, %v346_v25  ;;  %v341_v36 = vadd.f32 %v340_v39, %v339_v32 }
 0x2bf   :  { %v362_v41 = vsel %vm115_vm6, %v341_v36, %v361_v38 }
 0x2c0   :  { %v363_v42 = vsel %vm117_vm7, %v348_v40, %v362_v41 }
 0x2c1   :  { %365 = vst.msk [vmem:[#allocation6] sm:$0xff] %vm53_vm0, %v363_v42 }
 0x2c2   :  { %376 = dma.vmem_to_hbm [thread:$0]  %s372_s21, 128, %s374_s24, [#allocation5]  }
 0x2c3   :  { %460 = dma.done.wait [#allocation5], 128  }
 0x2c4   :  { %461 = vsyncadd [#allocation5], 4294967168 }
 0x2c5   :  { %381 = vsyncpa [#allocation4], 1 }
 0x2c6   :  { %382 = vsyncpa [#allocation5], 1 }

</bundles_post_ra>
